<compile_context>
chip_gen: v7x
topology: tpu7x:2x2x1
jax: 0.10.0
libtpu: 0.0.40
codegen_flags: <defaults>
</compile_context>

<pallas_src>
import functools

import jax
import jax.numpy as jnp
from jax.experimental import pallas as pl
from jax.experimental.pallas import tpu as pltpu


def _round_up(n, m):
    return ((n + m - 1) // m) * m


def qnetwork_kernel(x_ref, w1_ref, b1_ref, w2_ref, b2_ref, w3_ref, b3_ref, o_ref,
                    *, compute_dtype):
    """One batch tile: relu(relu(x @ W1 + b1) @ W2 + b2) @ W3 + b3."""
    # Biases: single f32 reads, hoisted ahead of the matmuls.
    b1 = b1_ref[...]
    b2 = b2_ref[...]
    b3 = b3_ref[...]

    # Weights arrive already in compute_dtype (pre-cast once in the wrapper).
    x = x_ref[...].astype(compute_dtype)

    # hidden layer 1: Linear + ReLU (f32 accumulate, f32 epilogue)
    h = jnp.dot(x, w1_ref[...], preferred_element_type=jnp.float32)
    h = jnp.maximum(h + b1, 0.0)

    # hidden layer 2: Linear + ReLU
    h = jnp.dot(h.astype(compute_dtype), w2_ref[...],
                preferred_element_type=jnp.float32)
    h = jnp.maximum(h + b2, 0.0)

    # output layer: Linear (no activation)
    out = jnp.dot(h.astype(compute_dtype), w3_ref[...],
                  preferred_element_type=jnp.float32) + b3
    o_ref[...] = out.astype(o_ref.dtype)


def qnetwork_forward(x, padded_params, action_size, *, tile_b=256,
                     megacore_split=False):
    """x: [B, state_size] float32.  padded_params: lane-dense ([in, out_pad]) params
    (weights may already be bf16).  Returns [B, action_size] float32.
    """
    B, S = x.shape
    w_dtype = padded_params["w1"].dtype
    use_bf16 = (w_dtype == jnp.bfloat16)
    compute_dtype = jnp.bfloat16 if use_bf16 else jnp.float32
    # bf16 output halves the (heavily padded) HBM writeback; wrapper upcasts.
    out_dtype = jnp.bfloat16 if use_bf16 else jnp.float32

    H1 = padded_params["w1"].shape[1]      # padded hidden 1 (multiple of 128)
    H2 = padded_params["w2"].shape[1]      # padded hidden 2 (multiple of 128)
    A_pad = padded_params["w3"].shape[1]   # padded action dim (multiple of 128)

    # Sublane granularity for the batch tile follows the narrowest operand
    # whose second-to-last dim is TB (the output tile): 8 for f32, 16 for bf16.
    g = 16 if out_dtype == jnp.bfloat16 else 8

    B8 = _round_up(B, g)
    TB = min(max(g, _round_up(tile_b, g)), B8)
    B_pad = _round_up(B8, TB)
    steps = B_pad // TB
    if megacore_split and B8 >= 2 * g:
        # v7x megacore: keep an even number of (>=2) steps so both TCs get work.
        if steps == 1:
            TB = _round_up(-(-B8 // 2), g)
            B_pad = 2 * TB
            steps = 2
        elif steps % 2 == 1:
            B_pad = (steps + 1) * TB
            steps += 1

    if B_pad != B:
        x = jnp.pad(x, ((0, B_pad - B), (0, 0)))

    grid = (steps,)

    # Weights / biases stay VMEM-resident across grid steps (block index (0, 0)).
    def fixed(shape):
        return pl.BlockSpec(shape, lambda i: (0, 0))

    in_specs = [
        pl.BlockSpec((TB, S), lambda i: (i, 0)),           # x tile streams in
        fixed((S, H1)), fixed((1, H1)),                    # w1, b1
        fixed((H1, H2)), fixed((1, H2)),                   # w2, b2
        fixed((H2, A_pad)), fixed((1, A_pad)),             # w3, b3
    ]
    out_specs = pl.BlockSpec((TB, A_pad), lambda i: (i, 0))

    w_bytes = jnp.dtype(w_dtype).itemsize
    o_bytes = jnp.dtype(out_dtype).itemsize
    flops = 2 * B_pad * (S * H1 + H1 * H2 + H2 * A_pad)
    bytes_accessed = (
        4 * B_pad * S                                        # x (f32)
        + w_bytes * (S * H1 + H1 * H2 + H2 * A_pad)          # weights
        + 4 * (H1 + H2 + A_pad)                              # biases (f32)
        + o_bytes * B_pad * A_pad                            # output
    )

    out_padded = pl.pallas_call(
        functools.partial(qnetwork_kernel, compute_dtype=compute_dtype),
        grid=grid,
        in_specs=in_specs,
        out_specs=out_specs,
        out_shape=jax.ShapeDtypeStruct((B_pad, A_pad), out_dtype),
        compiler_params=pltpu.CompilerParams(
            dimension_semantics=("parallel",),
        ),
        cost_estimate=pl.CostEstimate(
            flops=flops, transcendentals=0, bytes_accessed=bytes_accessed),
    )(
        x,
        padded_params["w1"], padded_params["b1"],
        padded_params["w2"], padded_params["b2"],
        padded_params["w3"], padded_params["b3"],
    )
    out = out_padded[:B, :action_size]
    return out.astype(jnp.float32)


def init_qnetwork_params(key, state_size, action_size, hidden_layers=None):
    """Deterministic init mimicking nn.Linear's U(-1/sqrt(fan_in), 1/sqrt(fan_in)).

    Weights are stored already transposed to [in, out]; biases as [1, out].
    """
    if not hidden_layers:
        hidden_layers = [state_size * 4, state_size * 4]
    sizes = [state_size] + list(hidden_layers) + [action_size]
    params = {}
    names = ["1", "2", "3"]
    assert len(sizes) - 1 == len(names), "this script builds the default 2-hidden-layer net"
    for i, name in enumerate(names):
        fan_in, fan_out = sizes[i], sizes[i + 1]
        key, kw, kb = jax.random.split(key, 3)
        bound = 1.0 / jnp.sqrt(jnp.float32(fan_in))
        params[f"w{name}"] = jax.random.uniform(
            kw, (fan_in, fan_out), jnp.float32, minval=-bound, maxval=bound
        )
        params[f"b{name}"] = jax.random.uniform(
            kb, (1, fan_out), jnp.float32, minval=-bound, maxval=bound
        )
    return params


def pad_params_lane_dense(params, weight_dtype=jnp.float32):
    """Zero-pad every layer's output (and subsequent input) dim to a multiple of 128.

    Zero padding keeps the forward pass bit-identical on the real action slots:
    padded columns compute 0 (zero weights + zero bias), ReLU(0)=0, and padded
    rows of the next weight matrix are zero, so they contribute nothing.

    Weights are cast ONCE here to `weight_dtype` (e.g. bf16 for MXU-native
    operands / half the weight DMA); biases stay f32 for the f32 epilogue.
    """
    padded = {}
    prev_in_pad = None  # padded input width of the current layer
    for name in ["1", "2", "3"]:
        w = params[f"w{name}"]
        b = params[f"b{name}"]
        fan_in, fan_out = w.shape
        in_pad = fan_in if prev_in_pad is None else prev_in_pad
        out_pad = _round_up(fan_out, 128)
        padded[f"w{name}"] = (
            jnp.zeros((in_pad, out_pad), jnp.float32).at[:fan_in, :fan_out].set(w)
        ).astype(weight_dtype)
        padded[f"b{name}"] = jnp.zeros((1, out_pad), jnp.float32
                                       ).at[:, :fan_out].set(b)
        prev_in_pad = out_pad
    return padded


def qnetwork_reference(x, params):
    """Plain-JAX reference of the same forward pass (for sanity checking)."""
    h = jnp.maximum(x @ params["w1"] + params["b1"], 0.0)
    h = jnp.maximum(h @ params["w2"] + params["b2"], 0.0)
    return h @ params["w3"] + params["b3"]


if __name__ == "__main__":
    STATE_SIZE = 8
    ACTION_SIZE = 4
    BATCH = 256       # batched replay/inference

    key = jax.random.PRNGKey(0)
    key, kx = jax.random.split(key)
    x = jax.random.normal(kx, (BATCH, STATE_SIZE), dtype=jnp.float32)

    params = init_qnetwork_params(key, STATE_SIZE, ACTION_SIZE)
    ref = qnetwork_reference(x, params)

    # Exact f32 path: tile_b=256 -> the whole batch runs as a single grid step.
    padded_f32 = pad_params_lane_dense(params, weight_dtype=jnp.float32)
    out_f32 = jax.block_until_ready(
        qnetwork_forward(x, padded_f32, ACTION_SIZE, tile_b=256))
    assert out_f32.shape == (BATCH, ACTION_SIZE)
    assert jnp.allclose(out_f32, ref, atol=1e-5, rtol=1e-5)

    # bf16 path: weights pre-cast once in the wrapper (half DMA / VMEM), f32
    # accumulation + epilogue, bf16 output writeback (half the padded store).
    padded_bf16 = pad_params_lane_dense(params, weight_dtype=jnp.bfloat16)
    out_bf16 = jax.block_until_ready(
        qnetwork_forward(x, padded_bf16, ACTION_SIZE, tile_b=256))
    assert out_bf16.shape == (BATCH, ACTION_SIZE)
    assert jnp.allclose(out_bf16, ref, atol=3e-2, rtol=3e-2)

    # v7x megacore variant: even 2-step grid so both TensorCores get a tile
    # (harmless extra step on v5e/v6e).
    out_mc = jax.block_until_ready(
        qnetwork_forward(x, padded_bf16, ACTION_SIZE, tile_b=256,
                         megacore_split=True))
    assert out_mc.shape == (BATCH, ACTION_SIZE)
    assert jnp.allclose(out_mc, ref, atol=3e-2, rtol=3e-2)

    print("KERNEL_OK")
</pallas_src>

<mosaic_0001>
module attributes {stable_mosaic.version = 11 : i64} {
  func.func @qnetwork_kernel(%arg0: i32, %arg1: memref<256x8xf32, #tpu.memory_space<vmem>>, %arg2: memref<8x128xf32, #tpu.memory_space<vmem>>, %arg3: memref<1x128xf32, #tpu.memory_space<vmem>>, %arg4: memref<128x128xf32, #tpu.memory_space<vmem>>, %arg5: memref<1x128xf32, #tpu.memory_space<vmem>>, %arg6: memref<128x128xf32, #tpu.memory_space<vmem>>, %arg7: memref<1x128xf32, #tpu.memory_space<vmem>>, %arg8: memref<256x128xf32, #tpu.memory_space<vmem>>) attributes {dimension_semantics = [#tpu.dimension_semantics<parallel>], iteration_bounds = array<i64: 1>, scalar_prefetch = 0 : i64, scratch_operands = 0 : i64, tpu.core_type = #tpu.core_type<tc>, window_params = [{transform_indices = @transform_0, window_bounds = array<i64: 256, 8>}, {pipeline_mode = #tpu.pipeline_mode<synchronous>, transform_indices = @transform_1, window_bounds = array<i64: 8, 128>}, {pipeline_mode = #tpu.pipeline_mode<synchronous>, transform_indices = @transform_2, window_bounds = array<i64: 1, 128>}, {pipeline_mode = #tpu.pipeline_mode<synchronous>, transform_indices = @transform_3, window_bounds = array<i64: 128, 128>}, {pipeline_mode = #tpu.pipeline_mode<synchronous>, transform_indices = @transform_4, window_bounds = array<i64: 1, 128>}, {pipeline_mode = #tpu.pipeline_mode<synchronous>, transform_indices = @transform_5, window_bounds = array<i64: 128, 128>}, {pipeline_mode = #tpu.pipeline_mode<synchronous>, transform_indices = @transform_6, window_bounds = array<i64: 1, 128>}, {transform_indices = @transform_7, window_bounds = array<i64: 256, 128>}]} {
    %c0 = arith.constant 0 : index
    %c0_0 = arith.constant 0 : index
    %0 = vector.load %arg3[%c0, %c0_0] : memref<1x128xf32, #tpu.memory_space<vmem>>, vector<1x128xf32>
    %c0_1 = arith.constant 0 : index
    %c0_2 = arith.constant 0 : index
    %1 = vector.load %arg5[%c0_1, %c0_2] : memref<1x128xf32, #tpu.memory_space<vmem>>, vector<1x128xf32>
    %c0_3 = arith.constant 0 : index
    %c0_4 = arith.constant 0 : index
    %2 = vector.load %arg7[%c0_3, %c0_4] : memref<1x128xf32, #tpu.memory_space<vmem>>, vector<1x128xf32>
    %c0_5 = arith.constant 0 : index
    %c0_6 = arith.constant 0 : index
    %3 = vector.load %arg1[%c0_5, %c0_6] : memref<256x8xf32, #tpu.memory_space<vmem>>, vector<256x8xf32>
    %c0_7 = arith.constant 0 : index
    %c0_8 = arith.constant 0 : index
    %4 = vector.load %arg2[%c0_7, %c0_8] : memref<8x128xf32, #tpu.memory_space<vmem>>, vector<8x128xf32>
    %cst = arith.constant dense<0.000000e+00> : vector<256x128xf32>
    %5 = tpu.matmul %3, %4, %cst {dimension_numbers = #tpu.dot_dimension_numbers<[1], [0], [0], [1], [0, 0, 1, 1], [], []>} : vector<256x8xf32>, vector<8x128xf32>, vector<256x128xf32> -> vector<256x128xf32>
    %6 = vector.broadcast %0 : vector<1x128xf32> to vector<256x128xf32>
    %7 = arith.addf %5, %6 : vector<256x128xf32>
    %cst_9 = arith.constant 0.000000e+00 : f32
    %8 = vector.broadcast %cst_9 : f32 to vector<256x128xf32>
    %9 = arith.maximumf %7, %8 : vector<256x128xf32>
    %c0_10 = arith.constant 0 : index
    %c0_11 = arith.constant 0 : index
    %10 = vector.load %arg4[%c0_10, %c0_11] : memref<128x128xf32, #tpu.memory_space<vmem>>, vector<128x128xf32>
    %cst_12 = arith.constant dense<0.000000e+00> : vector<256x128xf32>
    %11 = tpu.matmul %9, %10, %cst_12 {dimension_numbers = #tpu.dot_dimension_numbers<[1], [0], [0], [1], [0, 0, 1, 1], [], []>} : vector<256x128xf32>, vector<128x128xf32>, vector<256x128xf32> -> vector<256x128xf32>
    %12 = vector.broadcast %1 : vector<1x128xf32> to vector<256x128xf32>
    %13 = arith.addf %11, %12 : vector<256x128xf32>
    %cst_13 = arith.constant 0.000000e+00 : f32
    %14 = vector.broadcast %cst_13 : f32 to vector<256x128xf32>
    %15 = arith.maximumf %13, %14 : vector<256x128xf32>
    %c0_14 = arith.constant 0 : index
    %c0_15 = arith.constant 0 : index
    %16 = vector.load %arg6[%c0_14, %c0_15] : memref<128x128xf32, #tpu.memory_space<vmem>>, vector<128x128xf32>
    %cst_16 = arith.constant dense<0.000000e+00> : vector<256x128xf32>
    %17 = tpu.matmul %15, %16, %cst_16 {dimension_numbers = #tpu.dot_dimension_numbers<[1], [0], [0], [1], [0, 0, 1, 1], [], []>} : vector<256x128xf32>, vector<128x128xf32>, vector<256x128xf32> -> vector<256x128xf32>
    %18 = vector.broadcast %2 : vector<1x128xf32> to vector<256x128xf32>
    %19 = arith.addf %17, %18 : vector<256x128xf32>
    %c0_17 = arith.constant 0 : index
    %c0_18 = arith.constant 0 : index
    %20 = vector.load %arg8[%c0_17, %c0_18] : memref<256x128xf32, #tpu.memory_space<vmem>>, vector<256x128xf32>
    tpu.vector_store %arg8[%c0_17, %c0_18], %19 {strides = array<i32>} : memref<256x128xf32, #tpu.memory_space<vmem>>, vector<256x128xf32>,
    return
  }
  func.func @transform_0(%arg0: i32) -> (i32, i32) {
    %c0_i32 = arith.constant 0 : i32
    %c0_i32_0 = arith.constant 0 : i32
    return %arg0, %c0_i32 : i32, i32
  }
  func.func @transform_1(%arg0: i32) -> (i32, i32) {
    %c0_i32 = arith.constant 0 : i32
    %c0_i32_0 = arith.constant 0 : i32
    %c0_i32_1 = arith.constant 0 : i32
    return %c0_i32, %c0_i32_0 : i32, i32
  }
  func.func @transform_2(%arg0: i32) -> (i32, i32) {
    %c0_i32 = arith.constant 0 : i32
    %c0_i32_0 = arith.constant 0 : i32
    %c0_i32_1 = arith.constant 0 : i32
    return %c0_i32, %c0_i32_0 : i32, i32
  }
  func.func @transform_3(%arg0: i32) -> (i32, i32) {
    %c0_i32 = arith.constant 0 : i32
    %c0_i32_0 = arith.constant 0 : i32
    %c0_i32_1 = arith.constant 0 : i32
    return %c0_i32, %c0_i32_0 : i32, i32
  }
  func.func @transform_4(%arg0: i32) -> (i32, i32) {
    %c0_i32 = arith.constant 0 : i32
    %c0_i32_0 = arith.constant 0 : i32
    %c0_i32_1 = arith.constant 0 : i32
    return %c0_i32, %c0_i32_0 : i32, i32
  }
  func.func @transform_5(%arg0: i32) -> (i32, i32) {
    %c0_i32 = arith.constant 0 : i32
    %c0_i32_0 = arith.constant 0 : i32
    %c0_i32_1 = arith.constant 0 : i32
    return %c0_i32, %c0_i32_0 : i32, i32
  }
  func.func @transform_6(%arg0: i32) -> (i32, i32) {
    %c0_i32 = arith.constant 0 : i32
    %c0_i32_0 = arith.constant 0 : i32
    %c0_i32_1 = arith.constant 0 : i32
    return %c0_i32, %c0_i32_0 : i32, i32
  }
  func.func @transform_7(%arg0: i32) -> (i32, i32) {
    %c0_i32 = arith.constant 0 : i32
    %c0_i32_0 = arith.constant 0 : i32
    return %arg0, %c0_i32 : i32, i32
  }
}

</mosaic_0001>

<bundles_post_ra>
// kernel: tpu_custom_call.1
= control target key start
LH: loop header
LB: loop body
LE: loop exit
PB: predicated region body
PF: predicated region fallthrough
CT: control target
= control target key end

     0   :  { %vm69_vm0 = vcmask 64512   ;;  %s1869_s0 = inlined_call_operand.vmem [shape: f32[256,8], index: 0, kind: input, shape index: {}]   ;;  %s1870_s1 = inlined_call_operand.vmem [shape: f32[8,128], index: 1, kind: input, shape index: {}]   ;;  %s1871_s2 = inlined_call_operand.vmem [shape: f32[1,128], index: 2, kind: input, shape index: {}]   ;;  %s1872_s3 = inlined_call_operand.vmem [shape: f32[128,128], index: 3, kind: input, shape index: {}]   ;;  %s1873_s4 = inlined_call_operand.vmem [shape: f32[1,128], index: 4, kind: input, shape index: {}]   ;;  %s1874_s5 = inlined_call_operand.vmem [shape: f32[128,128], index: 5, kind: input, shape index: {}]   ;;  %s1875_s6 = inlined_call_operand.vmem [shape: f32[1,128], index: 6, kind: input, shape index: {}]   ;;  %s1876_s7 = inlined_call_operand.hbm [shape: f32[256,128], index: 7, kind: output, shape index: {}]  }
   0x1   :  { %v62_v0 = vld [vmem:[%s1870_s1] sm:$0xff]  ;;  %v31_v2 = vld [vmem:[%s1869_s0 + $0x8] sm:$0xff]  ;;  %v32_v3 = vld [vmem:[%s1869_s0 + $0x10] sm:$0xff] }
   0x2   :  { %v30_v1 = vld [vmem:[%s1869_s0] sm:$0xff]  ;;  %1161 = vmatprep.subr.mxu0 %v62_v0  ;;  %1435 = vmatprep.subr.mxu1 %v62_v0  ;;  %v33_v4 = vld [vmem:[%s1869_s0 + $0x18] sm:$0xff]  ;;  %v47_v7 = vld [vmem:[%s1869_s0 + $0x88] sm:$0xff] }
   0x3   :  { %1163 = vmatprep.mubr.msk.f32.mxu0 %vm69_vm0, %v30_v1  ;;  %1162 = vmatpush3.msra.mxu0 %v62_v0  ;;  %v34_v5 = vld [vmem:[%s1869_s0 + $0x20] sm:$0xff]  ;;  %v48_v8 = vld [vmem:[%s1869_s0 + $0x90] sm:$0xff]  ;;  %v35_v9 = vld [vmem:[%s1869_s0 + $0x28] sm:$0xff] }
   0x4   :  { %1164 = vmatmul.mubr.msk.f32.vlgmr.msra.gmra.mrb[0].mxu0 %vm69_vm0, %v31_v2  ;;  %1436 = vmatpush3.msra.mxu1 %v62_v0  ;;  %v46_v6 = vld [vmem:[%s1869_s0 + $0x80] sm:$0xff]  ;;  %v49_v10 = vld [vmem:[%s1869_s0 + $0x98] sm:$0xff]  ;;  %v36_v11 = vld [vmem:[%s1869_s0 + $0x30] sm:$0xff] }
   0x5   :  { %1166 = vmatprep.mubr.msk.f32.mxu0 %vm69_vm0, %v32_v3  ;;  %1187 = vmatprep.mubr.msk.f32.mxu1 %vm69_vm0, %v46_v6  ;;  %v50_v12 = vld [vmem:[%s1869_s0 + $0xa0] sm:$0xff]  ;;  %v424_v14 = vld [vmem:[%s1872_s3 + $0x8] sm:$0xff]  ;;  %v425_v15 = vld [vmem:[%s1872_s3 + $0x10] sm:$0xff] }
   0x6   :  { %1188 = vmatmul.mubr.msk.f32.vlgmr.msra.gmra.mrb[0].mxu1 %vm69_vm0, %v47_v7  ;;  %v423_v13 = vld [vmem:[%s1872_s3] sm:$0xff]  ;;  %v37_v16 = vld [vmem:[%s1869_s0 + $0x38] sm:$0xff]  ;;  %v51_v17 = vld [vmem:[%s1869_s0 + $0xa8] sm:$0xff] }
   0x7   :  { %1190 = vmatprep.mubr.msk.f32.mxu1 %vm69_vm0, %v48_v8  ;;  %v1371_v18 = vpack.c.bf16 %v424_v14, %v423_v13  ;;  %v426_v19 = vld [vmem:[%s1872_s3 + $0x18] sm:$0xff]  ;;  %v38_v20 = vld [vmem:[%s1869_s0 + $0x40] sm:$0xff]  ;;  %v52_v21 = vld [vmem:[%s1869_s0 + $0xb0] sm:$0xff] }
   0x8   :  { %1167 = vmatmul.mubr.msk.f32.gmra.mrb[2].mxu0 %vm69_vm0, %v33_v4  ;;  %v1375_v22 = vpack.c.bf16 %v426_v19, %v425_v15  ;;  %v427_v23 = vld [vmem:[%s1872_s3 + $0x20] sm:$0xff]  ;;  %v428_v24 = vld [vmem:[%s1872_s3 + $0x28] sm:$0xff] }
   0x9   :  { %1169 = vmatprep.mubr.msk.f32.mxu0 %vm69_vm0, %v34_v5  ;;  %1372 = vmatprep.subr.bf16.mxu1 %v1371_v18 }
   0xa   :  { %1191 = vmatmul.mubr.msk.f32.gmra.mrb[2].mxu1 %vm69_vm0, %v49_v10 }
   0xb   :  { %1193 = vmatprep.mubr.msk.f32.mxu1 %vm69_vm0, %v50_v12 }
   0xc   :  { %1170 = vmatmul.mubr.msk.f32.gmra.mrb[4].mxu0 %vm69_vm0, %v35_v9 }
   0xd   :  { %1172 = vmatprep.mubr.msk.f32.mxu0 %vm69_vm0, %v36_v11 }
   0xe   :  { %1194 = vmatmul.mubr.msk.f32.gmra.mrb[4].mxu1 %vm69_vm0, %v51_v17 }
  0x10   :  { %1173 = vmatmul.mubr.msk.f32.gmra.mrb[6].mxu0 %vm69_vm0, %v37_v16 }
  0x11   :  { %12 = vsyncpa [#allocation3], 0  ;;  %1175 = vmatprep.mubr.msk.f32.mxu0 %vm69_vm0, %v38_v20  ;;  %v39_v25 = vld [vmem:[%s1869_s0 + $0x48] sm:$0xff]  ;;  %1196 = vmatprep.mubr.msk.f32.mxu1 %vm69_vm0, %v52_v21  ;;  %v53_v26 = vld [vmem:[%s1869_s0 + $0xb8] sm:$0xff]  ;;  %v1379_v29 = vpack.c.bf16 %v428_v24, %v427_v23 }
  0x12   :  { %v40_v27 = vld [vmem:[%s1869_s0 + $0x50] sm:$0xff]  ;;  %v54_v28 = vld [vmem:[%s1869_s0 + $0xc0] sm:$0xff]  ;;  %1374 = vmatpush3.bf16.msra.mxu1 %v1371_v18  ;;  %v430_v31 = vld [vmem:[%s1872_s3 + $0x38] sm:$0xff] }
  0x13   :  { %1376 = vmatprep.subr.bf16.mxu1 %v1375_v22  ;;  %1197 = vmatmul.mubr.msk.f32.gmra.mrb[6].mxu1 %vm69_vm0, %v53_v26  ;;  %v429_v30 = vld [vmem:[%s1872_s3 + $0x30] sm:$0xff]  ;;  %v41_v32 = vld [vmem:[%s1869_s0 + $0x58] sm:$0xff]  ;;  %v55_v33 = vld [vmem:[%s1869_s0 + $0xc8] sm:$0xff] }
  0x14   :  { %1176 = vmatmul.mubr.msk.f32.gmra.mrb[8].mxu0 %vm69_vm0, %v39_v25  ;;  %1199 = vmatprep.mubr.msk.f32.mxu1 %vm69_vm0, %v54_v28  ;;  %v42_v34 = vld [vmem:[%s1869_s0 + $0x60] sm:$0xff]  ;;  %v56_v35 = vld [vmem:[%s1869_s0 + $0xd0] sm:$0xff]  ;;  %v1383_v36 = vpack.c.bf16 %v430_v31, %v429_v30  ;;  %v432_v38 = vld [vmem:[%s1872_s3 + $0x48] sm:$0xff] }
  0x15   :  { %1178 = vmatprep.mubr.msk.f32.mxu0 %vm69_vm0, %v40_v27  ;;  %v431_v37 = vld [vmem:[%s1872_s3 + $0x40] sm:$0xff]  ;;  %v43_v39 = vld [vmem:[%s1869_s0 + $0x68] sm:$0xff]  ;;  %v57_v40 = vld [vmem:[%s1869_s0 + $0xd8] sm:$0xff] }
  0x16   :  { %1378 = vmatpush3.bf16.msra.mxu1 %v1375_v22  ;;  %v44_v41 = vld [vmem:[%s1869_s0 + $0x70] sm:$0xff]  ;;  %v58_v42 = vld [vmem:[%s1869_s0 + $0xe0] sm:$0xff]  ;;  %v1387_v43 = vpack.c.bf16 %v432_v38, %v431_v37  ;;  %v434_v45 = vld [vmem:[%s1872_s3 + $0x58] sm:$0xff] }
  0x17   :  { %1380 = vmatprep.subr.bf16.mxu1 %v1379_v29  ;;  %1200 = vmatmul.mubr.msk.f32.gmra.mrb[8].mxu1 %vm69_vm0, %v55_v33  ;;  %v433_v44 = vld [vmem:[%s1872_s3 + $0x50] sm:$0xff]  ;;  %v45_v46 = vld [vmem:[%s1869_s0 + $0x78] sm:$0xff]  ;;  %v59_v47 = vld [vmem:[%s1869_s0 + $0xe8] sm:$0xff] }
  0x18   :  { %1179 = vmatmul.mubr.msk.f32.gmra.mrb[10].mxu0 %vm69_vm0, %v41_v32  ;;  %1202 = vmatprep.mubr.msk.f32.mxu1 %vm69_vm0, %v56_v35  ;;  %v60_v48 = vld [vmem:[%s1869_s0 + $0xf0] sm:$0xff]  ;;  %v1391_v49 = vpack.c.bf16 %v434_v45, %v433_v44  ;;  %v435_v50 = vld [vmem:[%s1872_s3 + $0x60] sm:$0xff]  ;;  %v436_v51 = vld [vmem:[%s1872_s3 + $0x68] sm:$0xff] }
  0x19   :  { %1181 = vmatprep.mubr.msk.f32.mxu0 %vm69_vm0, %v42_v34  ;;  %v61_v52 = vld [vmem:[%s1869_s0 + $0xf8] sm:$0xff]  ;;  %v1395_v53 = vpack.c.bf16 %v436_v51, %v435_v50  ;;  %v437_v54 = vld [vmem:[%s1872_s3 + $0x70] sm:$0xff]  ;;  %v702_v57 = vld [vmem:[%s1874_s5] sm:$0xff] }
  0x1a   :  { %1382 = vmatpush3.bf16.msra.mxu1 %v1379_v29  ;;  %v438_v55 = vld [vmem:[%s1872_s3 + $0x78] sm:$0xff]  ;;  %v703_v58 = vld [vmem:[%s1874_s5 + $0x8] sm:$0xff]  ;;  %v704_v59 = vld [vmem:[%s1874_s5 + $0x10] sm:$0xff] }
  0x1b   :  { %1384 = vmatprep.subr.bf16.mxu1 %v1383_v36  ;;  %1203 = vmatmul.mubr.msk.f32.gmra.mrb[10].mxu1 %vm69_vm0, %v57_v40  ;;  %v1399_v56 = vpack.c.bf16 %v438_v55, %v437_v54  ;;  %v1403_v60 = vpack.c.bf16 %v703_v58, %v702_v57  ;;  %v705_v61 = vld [vmem:[%s1874_s5 + $0x18] sm:$0xff]  ;;  %v706_v63 = vld [vmem:[%s1874_s5 + $0x20] sm:$0xff]  ;;  %v707_v0 = vld [vmem:[%s1874_s5 + $0x28] sm:$0xff] }
  0x1c   :  { %1182 = vmatmul.mubr.msk.f32.gmra.mrb[12].mxu0 %vm69_vm0, %v43_v39  ;;  %1205 = vmatprep.mubr.msk.f32.mxu1 %vm69_vm0, %v58_v42  ;;  %v1407_v62 = vpack.c.bf16 %v705_v61, %v704_v59  ;;  %v1411_v1 = vpack.c.bf16 %v707_v0, %v706_v63  ;;  %v708_v2 = vld [vmem:[%s1874_s5 + $0x30] sm:$0xff]  ;;  %v709_v3 = vld [vmem:[%s1874_s5 + $0x38] sm:$0xff]  ;;  %v710_v5 = vld [vmem:[%s1874_s5 + $0x40] sm:$0xff] }
  0x1d   :  { %1184 = vmatprep.mubr.msk.f32.mxu0 %vm69_vm0, %v44_v41  ;;  %1404 = vmatprep.subr.bf16.mxu0 %v1403_v60  ;;  %v1415_v4 = vpack.c.bf16 %v709_v3, %v708_v2  ;;  %v711_v6 = vld [vmem:[%s1874_s5 + $0x48] sm:$0xff]  ;;  %v712_v8 = vld [vmem:[%s1874_s5 + $0x50] sm:$0xff]  ;;  %v713_v9 = vld [vmem:[%s1874_s5 + $0x58] sm:$0xff] }
  0x1e   :  { %1386 = vmatpush3.bf16.msra.mxu1 %v1383_v36  ;;  %1406 = vmatpush3.bf16.msra.mxu0 %v1403_v60  ;;  %v1419_v7 = vpack.c.bf16 %v711_v6, %v710_v5  ;;  %v1423_v10 = vpack.c.bf16 %v713_v9, %v712_v8  ;;  %v714_v11 = vld [vmem:[%s1874_s5 + $0x60] sm:$0xff]  ;;  %v715_v12 = vld [vmem:[%s1874_s5 + $0x68] sm:$0xff] }
  0x1f   :  { %1388 = vmatprep.subr.bf16.mxu1 %v1387_v43  ;;  %1206 = vmatmul.mubr.msk.f32.gmra.mrb[12].mxu1 %vm69_vm0, %v59_v47  ;;  %v1427_v13 = vpack.c.bf16 %v715_v12, %v714_v11  ;;  %v1731_v14 = vld [vmem:[%s1871_s2] ss:$0 sm:$0xff] }
  0x20   :  { %1185 = vmatmul.mubr.msk.f32.gmra.mrb[14].mxu0 %vm69_vm0, %v45_v46  ;;  %1208 = vmatprep.mubr.msk.f32.mxu1 %vm69_vm0, %v60_v48 }
  0x21   :  { %1408 = vmatprep.subr.bf16.mxu0 %v1407_v62 }
  0x22   :  { %1390 = vmatpush3.bf16.msra.mxu1 %v1387_v43  ;;  %1410 = vmatpush3.bf16.msra.mxu0 %v1407_v62 }
  0x23   :  { %1392 = vmatprep.subr.bf16.mxu1 %v1391_v49  ;;  %1209 = vmatmul.mubr.msk.f32.gmra.mrb[14].mxu1 %vm69_vm0, %v61_v52 }
  0x24   :  { %1412 = vmatprep.subr.bf16.mxu0 %v1411_v1 }
  0x26   :  { %1394 = vmatpush3.bf16.msra.mxu1 %v1391_v49  ;;  %1414 = vmatpush3.bf16.msra.mxu0 %v1411_v1 }
  0x27   :  { %1396 = vmatprep.subr.bf16.mxu1 %v1395_v53  ;;  %1416 = vmatprep.subr.bf16.mxu0 %v1415_v4 }
  0x2a   :  { %1398 = vmatpush3.bf16.msra.mxu1 %v1395_v53  ;;  %1418 = vmatpush3.bf16.msra.mxu0 %v1415_v4 }
  0x2b   :  { %1400 = vmatprep.subr.bf16.mxu1 %v1399_v56  ;;  %1420 = vmatprep.subr.bf16.mxu0 %v1419_v7 }
  0x2e   :  { %1402 = vmatpush3.bf16.msra.mxu1 %v1399_v56  ;;  %1422 = vmatpush3.bf16.msra.mxu0 %v1419_v7 }
  0x2f   :  { %1424 = vmatprep.subr.bf16.mxu0 %v1423_v10 }
  0x32   :  { %1426 = vmatpush3.bf16.msra.mxu0 %v1423_v10 }
  0x33   :  { %1428 = vmatprep.subr.bf16.mxu0 %v1427_v13 }
  0x36   :  { %1430 = vmatpush3.bf16.msra.mxu0 %v1427_v13 }
  0xd7   :  { %v1165_v15 = vpop.f32.mrb[0].mxu0 }
  0xd8   :  { %v238_v16 = vadd.f32 %v1165_v15, %v1731_v14  ;;  %v232_v17 = vpop.f32.mrb[1].mxu0 }
  0xd9   :  { %v233_v18 = vadd.f32 %v1731_v14, %v232_v17  ;;  %v1735_v21 = vpop.f32.mrb[0].mxu1 }
  0xda   :  { %v392_v22 = vmax.f32 %v238_v16, 0.0  ;;  %v312_v25 = vpop.f32.mrb[1].mxu1 }
  0xdb   :  { %v391_v19 = vmax.f32 %v233_v18, 0.0  ;;  %v1168_v20 = vpop.f32.mrb[2].mxu0  ;;  %v313_v5 = vadd.f32 %v1731_v14, %v312_v25  ;;  %v318_v18 = vadd.f32 %v1735_v21, %v1731_v14 }
  0xdc   :  { %v248_v23 = vadd.f32 %v1168_v20, %v1731_v14  ;;  %v242_v24 = vpop.f32.mrb[3].mxu0 }
  0xdd   :  { %v243_v26 = vadd.f32 %v1731_v14, %v242_v24  ;;  %1243 = vmatprep.mubr.f32.mxu1 %v391_v19  ;;  %v1739_v29 = vpop.f32.mrb[2].mxu1  ;;  %v407_v13 = vmax.f32 %v313_v5, 0.0 }
  0xde   :  { %1244 = vmatmul.mubr.f32.vlgmr.msra.gmra.mrb[16].mxu1 %v392_v22  ;;  %v394_v30 = vmax.f32 %v248_v23, 0.0  ;;  %v322_v33 = vpop.f32.mrb[3].mxu1  ;;  %v408_v23 = vmax.f32 %v318_v18, 0.0  ;;  %v328_v24 = vadd.f32 %v1739_v29, %v1731_v14 }
  0xdf   :  { %v393_v27 = vmax.f32 %v243_v26, 0.0  ;;  %v1171_v28 = vpop.f32.mrb[4].mxu0  ;;  %v323_v15 = vadd.f32 %v1731_v14, %v322_v33 }
  0xe0   :  { %v258_v31 = vadd.f32 %v1171_v28, %v1731_v14  ;;  %v252_v32 = vpop.f32.mrb[5].mxu0 }
  0xe1   :  { %v253_v34 = vadd.f32 %v1731_v14, %v252_v32  ;;  %1246 = vmatprep.mubr.f32.mxu1 %v393_v27  ;;  %v1743_v37 = vpop.f32.mrb[4].mxu1  ;;  %v409_v20 = vmax.f32 %v323_v15, 0.0  ;;  %v410_v27 = vmax.f32 %v328_v24, 0.0 }
  0xe2   :  { %1247 = vmatmul.mubr.f32.gmra.mrb[18].mxu1 %v394_v30  ;;  %v396_v38 = vmax.f32 %v258_v31, 0.0  ;;  %v332_v41 = vpop.f32.mrb[5].mxu1  ;;  %v338_v21 = vadd.f32 %v1743_v37, %v1731_v14 }
  0xe3   :  { %v395_v35 = vmax.f32 %v253_v34, 0.0  ;;  %v1174_v36 = vpop.f32.mrb[6].mxu0  ;;  %v333_v22 = vadd.f32 %v1731_v14, %v332_v41 }
  0xe4   :  { %v268_v39 = vadd.f32 %v1174_v36, %v1731_v14  ;;  %v262_v40 = vpop.f32.mrb[7].mxu0  ;;  %v412_v31 = vmax.f32 %v338_v21, 0.0 }
  0xe5   :  { %v263_v42 = vadd.f32 %v1731_v14, %v262_v40  ;;  %1249 = vmatprep.mubr.f32.mxu1 %v395_v35  ;;  %v411_v25 = vmax.f32 %v333_v22, 0.0 }
  0xe6   :  { %1250 = vmatmul.mubr.f32.gmra.mrb[20].mxu1 %v396_v38  ;;  %v1747_v45 = vpop.f32.mrb[6].mxu1  ;;  %v398_v46 = vmax.f32 %v268_v39, 0.0 }
  0xe7   :  { %v397_v43 = vmax.f32 %v263_v42, 0.0  ;;  %v1177_v44 = vpop.f32.mrb[8].mxu0  ;;  %v342_v49 = vpop.f32.mrb[7].mxu1  ;;  %v348_v32 = vadd.f32 %v1747_v45, %v1731_v14 }
  0xe8   :  { %v278_v47 = vadd.f32 %v1177_v44, %v1731_v14  ;;  %v272_v48 = vpop.f32.mrb[9].mxu0  ;;  %v343_v26 = vadd.f32 %v1731_v14, %v342_v49  ;;  %v717_v49 = vld [vmem:[%s1874_s5 + $0x78] sm:$0xff] }
  0xe9   :  { %v273_v50 = vadd.f32 %v1731_v14, %v272_v48  ;;  %1252 = vmatprep.mubr.f32.mxu1 %v397_v43  ;;  %v414_v34 = vmax.f32 %v348_v32, 0.0  ;;  %v716_v48 = vld [vmem:[%s1874_s5 + $0x70] sm:$0xff] }
  0xea   :  { %1253 = vmatmul.mubr.f32.gmra.mrb[22].mxu1 %v398_v46  ;;  %v1201_v53 = vpop.f32.mrb[8].mxu1  ;;  %v400_v54 = vmax.f32 %v278_v47, 0.0  ;;  %v413_v28 = vmax.f32 %v343_v26, 0.0 }
  0xeb   :  { %v399_v51 = vmax.f32 %v273_v50, 0.0  ;;  %v1180_v52 = vpop.f32.mrb[10].mxu0  ;;  %v352_v57 = vpop.f32.mrb[9].mxu1  ;;  %v358_v35 = vadd.f32 %v1201_v53, %v1731_v14  ;;  %v1431_v50 = vpack.c.bf16 %v717_v49, %v716_v48 }
  0xec   :  { %v288_v55 = vadd.f32 %v1180_v52, %v1731_v14  ;;  %v282_v56 = vpop.f32.mrb[11].mxu0  ;;  %v353_v30 = vadd.f32 %v1731_v14, %v352_v57 }
  0xed   :  { %v283_v58 = vadd.f32 %v1731_v14, %v282_v56  ;;  %1255 = vmatprep.mubr.f32.mxu1 %v399_v51  ;;  %v416_v38 = vmax.f32 %v358_v35, 0.0  ;;  %1432 = vmatprep.subr.bf16.mxu0 %v1431_v50  ;;  %v1786_v51 = vld [vmem:[%s1873_s4] ss:$0 sm:$0xff] }
  0xee   :  { %1256 = vmatmul.mubr.f32.gmra.mrb[24].mxu1 %v400_v54  ;;  %v1204_v61 = vpop.f32.mrb[10].mxu1  ;;  %v402_v62 = vmax.f32 %v288_v55, 0.0  ;;  %v415_v29 = vmax.f32 %v353_v30, 0.0  ;;  %1434 = vmatpush3.bf16.msra.mxu0 %v1431_v50 }
  0xef   :  { %v401_v59 = vmax.f32 %v283_v58, 0.0  ;;  %v1183_v60 = vpop.f32.mrb[12].mxu0  ;;  %v362_v1 = vpop.f32.mrb[11].mxu1  ;;  %v368_v39 = vadd.f32 %v1204_v61, %v1731_v14 }
  0xf0   :  { %v298_v63 = vadd.f32 %v1183_v60, %v1731_v14  ;;  %v292_v0 = vpop.f32.mrb[13].mxu0  ;;  %v363_v33 = vadd.f32 %v1731_v14, %v362_v1 }
  0xf1   :  { %v293_v2 = vadd.f32 %v1731_v14, %v292_v0  ;;  %1258 = vmatprep.mubr.f32.mxu1 %v401_v59  ;;  %v418_v42 = vmax.f32 %v368_v39, 0.0 }
  0xf2   :  { %1259 = vmatmul.mubr.f32.gmra.mrb[26].mxu1 %v402_v62  ;;  %v1207_v6 = vpop.f32.mrb[12].mxu1  ;;  %v404_v7 = vmax.f32 %v298_v63, 0.0  ;;  %v417_v36 = vmax.f32 %v363_v33, 0.0 }
  0xf3   :  { %v403_v3 = vmax.f32 %v293_v2, 0.0  ;;  %v1186_v4 = vpop.f32.mrb[14].mxu0  ;;  %v372_v10 = vpop.f32.mrb[13].mxu1  ;;  %v378_v43 = vadd.f32 %v1207_v6, %v1731_v14 }
  0xf4   :  { %v308_v8 = vadd.f32 %v1186_v4, %v1731_v14  ;;  %v302_v9 = vpop.f32.mrb[15].mxu0  ;;  %v373_v37 = vadd.f32 %v1731_v14, %v372_v10 }
  0xf5   :  { %v303_v11 = vadd.f32 %v1731_v14, %v302_v9  ;;  %1261 = vmatprep.mubr.f32.mxu1 %v403_v3  ;;  %v420_v45 = vmax.f32 %v378_v43, 0.0 }
  0xf6   :  { %1262 = vmatmul.mubr.f32.gmra.mrb[28].mxu1 %v404_v7  ;;  %v1210_v16 = vpop.f32.mrb[14].mxu1  ;;  %v406_v17 = vmax.f32 %v308_v8, 0.0  ;;  %v419_v40 = vmax.f32 %v373_v37, 0.0 }
  0xf7   :  { %v405_v12 = vmax.f32 %v303_v11, 0.0  ;;  %v382_v19 = vpop.f32.mrb[15].mxu1  ;;  %v388_v46 = vadd.f32 %v1210_v16, %v1731_v14 }
  0xf8   :  { %v383_v41 = vadd.f32 %v1731_v14, %v382_v19 }
  0xf9   :  { %1264 = vmatprep.mubr.f32.mxu1 %v405_v12  ;;  %v422_v47 = vmax.f32 %v388_v46, 0.0 }
  0xfa   :  { %1265 = vmatmul.mubr.f32.gmra.mrb[30].mxu1 %v406_v17  ;;  %v421_v44 = vmax.f32 %v383_v41, 0.0 }
  0xfb   :  { %1267 = vmatprep.mubr.f32.mxu1 %v407_v13 }
  0xfe   :  { %1268 = vmatmul.mubr.f32.gmra.mrb[32].mxu1 %v408_v23 }
  0xff   :  { %1270 = vmatprep.mubr.f32.mxu1 %v409_v20 }
 0x102   :  { %1271 = vmatmul.mubr.f32.gmra.mrb[34].mxu1 %v410_v27 }
 0x103   :  { %1273 = vmatprep.mubr.f32.mxu1 %v411_v25 }
 0x106   :  { %1274 = vmatmul.mubr.f32.gmra.mrb[36].mxu1 %v412_v31 }
 0x107   :  { %1276 = vmatprep.mubr.f32.mxu1 %v413_v28 }
 0x10a   :  { %1277 = vmatmul.mubr.f32.gmra.mrb[38].mxu1 %v414_v34 }
 0x10b   :  { %1279 = vmatprep.mubr.f32.mxu1 %v415_v29 }
 0x10e   :  { %1280 = vmatmul.mubr.f32.gmra.mrb[40].mxu1 %v416_v38 }
 0x10f   :  { %1282 = vmatprep.mubr.f32.mxu1 %v417_v36 }
 0x112   :  { %1283 = vmatmul.mubr.f32.gmra.mrb[42].mxu1 %v418_v42 }
 0x113   :  { %1285 = vmatprep.mubr.f32.mxu1 %v419_v40 }
 0x116   :  { %1286 = vmatmul.mubr.f32.gmra.mrb[44].mxu1 %v420_v45 }
 0x117   :  { %1288 = vmatprep.mubr.f32.mxu1 %v421_v44 }
 0x11a   :  { %1289 = vmatmul.mubr.f32.gmra.mrb[46].mxu1 %v422_v47 }
 0x1b1   :  { %v1245_v14 = vpop.f32.mrb[16].mxu1 }
 0x1b2   :  { %v517_v52 = vadd.f32 %v1245_v14, %v1786_v51  ;;  %v511_v53 = vpop.f32.mrb[17].mxu1 }
 0x1b3   :  { %v512_v54 = vadd.f32 %v1786_v51, %v511_v53 }
 0x1b4   :  { %v671_v57 = vmax.f32 %v517_v52, 0.0 }
 0x1b5   :  { %v670_v55 = vmax.f32 %v512_v54, 0.0  ;;  %v1248_v56 = vpop.f32.mrb[18].mxu1 }
 0x1b6   :  { %v527_v58 = vadd.f32 %v1248_v56, %v1786_v51  ;;  %v521_v59 = vpop.f32.mrb[19].mxu1 }
 0x1b7   :  { %v522_v60 = vadd.f32 %v1786_v51, %v521_v59  ;;  %1323 = vmatprep.mubr.f32.mxu0 %v670_v55 }
 0x1b8   :  { %1324 = vmatmul.mubr.f32.vlgmr.msra.gmra.mrb[16].mxu0 %v671_v57  ;;  %v673_v63 = vmax.f32 %v527_v58, 0.0 }
 0x1b9   :  { %v672_v61 = vmax.f32 %v522_v60, 0.0  ;;  %v1251_v62 = vpop.f32.mrb[20].mxu1 }
 0x1ba   :  { %v537_v0 = vadd.f32 %v1251_v62, %v1786_v51  ;;  %v531_v1 = vpop.f32.mrb[21].mxu1 }
 0x1bb   :  { %v532_v2 = vadd.f32 %v1786_v51, %v531_v1  ;;  %1326 = vmatprep.mubr.f32.mxu0 %v672_v61 }
 0x1bc   :  { %1327 = vmatmul.mubr.f32.gmra.mrb[18].mxu0 %v673_v63  ;;  %v675_v5 = vmax.f32 %v537_v0, 0.0 }
 0x1bd   :  { %v674_v3 = vmax.f32 %v532_v2, 0.0  ;;  %v1254_v4 = vpop.f32.mrb[22].mxu1 }
 0x1be   :  { %v547_v6 = vadd.f32 %v1254_v4, %v1786_v51  ;;  %v541_v7 = vpop.f32.mrb[23].mxu1 }
 0x1bf   :  { %v542_v8 = vadd.f32 %v1786_v51, %v541_v7  ;;  %1329 = vmatprep.mubr.f32.mxu0 %v674_v3 }
 0x1c0   :  { %1330 = vmatmul.mubr.f32.gmra.mrb[20].mxu0 %v675_v5  ;;  %v677_v11 = vmax.f32 %v547_v6, 0.0 }
 0x1c1   :  { %v676_v9 = vmax.f32 %v542_v8, 0.0  ;;  %v1257_v10 = vpop.f32.mrb[24].mxu1 }
 0x1c2   :  { %v557_v12 = vadd.f32 %v1257_v10, %v1786_v51  ;;  %v551_v13 = vpop.f32.mrb[25].mxu1 }
 0x1c3   :  { %v552_v15 = vadd.f32 %v1786_v51, %v551_v13  ;;  %1332 = vmatprep.mubr.f32.mxu0 %v676_v9 }
 0x1c4   :  { %1333 = vmatmul.mubr.f32.gmra.mrb[22].mxu0 %v677_v11  ;;  %v679_v18 = vmax.f32 %v557_v12, 0.0 }
 0x1c5   :  { %v678_v16 = vmax.f32 %v552_v15, 0.0  ;;  %v1260_v17 = vpop.f32.mrb[26].mxu1 }
 0x1c6   :  { %v567_v19 = vadd.f32 %v1260_v17, %v1786_v51  ;;  %v561_v20 = vpop.f32.mrb[27].mxu1 }
 0x1c7   :  { %v562_v22 = vadd.f32 %v1786_v51, %v561_v20  ;;  %1335 = vmatprep.mubr.f32.mxu0 %v678_v16 }
 0x1c8   :  { %1336 = vmatmul.mubr.f32.gmra.mrb[24].mxu0 %v679_v18  ;;  %v681_v25 = vmax.f32 %v567_v19, 0.0 }
 0x1c9   :  { %v680_v23 = vmax.f32 %v562_v22, 0.0  ;;  %v1263_v24 = vpop.f32.mrb[28].mxu1  ;;  %v1823_v22 = vld [vmem:[%s1875_s6] ss:$0 sm:$0xff]  ;;  %s1464_s6 = smov [#allocation2]  }
 0x1ca   :  { %v577_v26 = vadd.f32 %v1263_v24, %v1786_v51  ;;  %v571_v27 = vpop.f32.mrb[29].mxu1  ;;  %s986_s9 = sshll.u32 %s1464_s6, 4  ;;  %s987_s9 = int_to_ptr.vmem [resolvable:$true] %s986_s9 }
 0x1cb   :  { %v572_v21 = vadd.f32 %v1786_v51, %v571_v27  ;;  %1338 = vmatprep.mubr.f32.mxu0 %v680_v23  ;;  %s1440_s10 = scalar_lea.vmem %s987_s9, 4096  ;;  %p1445_p1 = scmp.lt.s32.totalorder %s987_s9, %s987_s9 }
 0x1cc   :  { %1339 = vmatmul.mubr.f32.gmra.mrb[26].mxu0 %v681_v25  ;;  %v683_v31 = vmax.f32 %v577_v26, 0.0  ;;  %p1441_p0 = scmp.ne.s32.totalorder %s987_s9, %s1440_s10  ;;  %p1446_p2 = scmp.lt.s32.totalorder %s1440_s10, %s1440_s10 }
 0x1cd   :  { %v682_v28 = vmax.f32 %v572_v21, 0.0  ;;  %v1266_v30 = vpop.f32.mrb[30].mxu1 }
 0x1ce   :  { %v587_v32 = vadd.f32 %v1266_v30, %v1786_v51  ;;  %v581_v29 = vpop.f32.mrb[31].mxu1  ;;  %p1447_p3 = por %p1446_p2, %p1445_p1 }
 0x1cf   :  { %v582_v33 = vadd.f32 %v1786_v51, %v581_v29  ;;  %1341 = vmatprep.mubr.f32.mxu0 %v682_v28 }
 0x1d0   :  { %1342 = vmatmul.mubr.f32.gmra.mrb[28].mxu0 %v683_v31  ;;  %v685_v36 = vmax.f32 %v587_v32, 0.0  ;;  %p1448_p4 = pnand %p1447_p3, %p1441_p0 }
 0x1d1   :  { %v684_v34 = vmax.f32 %v582_v33, 0.0  ;;  %v1269_v35 = vpop.f32.mrb[32].mxu1 }
 0x1d2   :  { %v597_v37 = vadd.f32 %v1269_v35, %v1786_v51  ;;  %v591_v38 = vpop.f32.mrb[33].mxu1 }
 0x1d3   :  { %v592_v39 = vadd.f32 %v1786_v51, %v591_v38  ;;  %1344 = vmatprep.mubr.f32.mxu0 %v684_v34 }
 0x1d4   :  { %1345 = vmatmul.mubr.f32.gmra.mrb[30].mxu0 %v685_v36  ;;  %v687_v42 = vmax.f32 %v597_v37, 0.0 }
 0x1d5   :  { %v686_v40 = vmax.f32 %v592_v39, 0.0  ;;  %v1272_v41 = vpop.f32.mrb[34].mxu1 }
 0x1d6   :  { %v607_v43 = vadd.f32 %v1272_v41, %v1786_v51  ;;  %v601_v44 = vpop.f32.mrb[35].mxu1 }
 0x1d7   :  { %v602_v45 = vadd.f32 %v1786_v51, %v601_v44  ;;  %1347 = vmatprep.mubr.f32.mxu0 %v686_v40 }
 0x1d8   :  { %1348 = vmatmul.mubr.f32.gmra.mrb[32].mxu0 %v687_v42  ;;  %v689_v48 = vmax.f32 %v607_v43, 0.0 }
 0x1d9   :  { %v688_v46 = vmax.f32 %v602_v45, 0.0  ;;  %v1275_v47 = vpop.f32.mrb[36].mxu1 }
 0x1da   :  { %v617_v49 = vadd.f32 %v1275_v47, %v1786_v51  ;;  %v611_v50 = vpop.f32.mrb[37].mxu1 }
 0x1db   :  { %v612_v14 = vadd.f32 %v1786_v51, %v611_v50  ;;  %1350 = vmatprep.mubr.f32.mxu0 %v688_v46 }
 0x1dc   :  { %1351 = vmatmul.mubr.f32.gmra.mrb[34].mxu0 %v689_v48  ;;  %v691_v54 = vmax.f32 %v617_v49, 0.0 }
 0x1dd   :  { %v690_v52 = vmax.f32 %v612_v14, 0.0  ;;  %v1278_v53 = vpop.f32.mrb[38].mxu1 }
 0x1de   :  { %v627_v55 = vadd.f32 %v1278_v53, %v1786_v51  ;;  %v621_v56 = vpop.f32.mrb[39].mxu1 }
 0x1df   :  { %v622_v57 = vadd.f32 %v1786_v51, %v621_v56  ;;  %1353 = vmatprep.mubr.f32.mxu0 %v690_v52 }
 0x1e0   :  { %1354 = vmatmul.mubr.f32.gmra.mrb[36].mxu0 %v691_v54  ;;  %v693_v60 = vmax.f32 %v627_v55, 0.0 }
 0x1e1   :  { %v692_v58 = vmax.f32 %v622_v57, 0.0  ;;  %v1281_v59 = vpop.f32.mrb[40].mxu1 }
 0x1e2   :  { %v637_v61 = vadd.f32 %v1281_v59, %v1786_v51  ;;  %v631_v62 = vpop.f32.mrb[41].mxu1 }
 0x1e3   :  { %v632_v63 = vadd.f32 %v1786_v51, %v631_v62  ;;  %1356 = vmatprep.mubr.f32.mxu0 %v692_v58 }
 0x1e4   :  { %1357 = vmatmul.mubr.f32.gmra.mrb[38].mxu0 %v693_v60  ;;  %v695_v2 = vmax.f32 %v637_v61, 0.0 }
 0x1e5   :  { %v694_v0 = vmax.f32 %v632_v63, 0.0  ;;  %v1284_v1 = vpop.f32.mrb[42].mxu1 }
 0x1e6   :  { %v647_v3 = vadd.f32 %v1284_v1, %v1786_v51  ;;  %v641_v4 = vpop.f32.mrb[43].mxu1 }
 0x1e7   :  { %v642_v5 = vadd.f32 %v1786_v51, %v641_v4  ;;  %1359 = vmatprep.mubr.f32.mxu0 %v694_v0 }
 0x1e8   :  { %1360 = vmatmul.mubr.f32.gmra.mrb[40].mxu0 %v695_v2  ;;  %v697_v8 = vmax.f32 %v647_v3, 0.0 }
 0x1e9   :  { %v696_v6 = vmax.f32 %v642_v5, 0.0  ;;  %v1287_v7 = vpop.f32.mrb[44].mxu1 }
 0x1ea   :  { %v657_v9 = vadd.f32 %v1287_v7, %v1786_v51  ;;  %v651_v10 = vpop.f32.mrb[45].mxu1 }
 0x1eb   :  { %v652_v11 = vadd.f32 %v1786_v51, %v651_v10  ;;  %1362 = vmatprep.mubr.f32.mxu0 %v696_v6 }
 0x1ec   :  { %1363 = vmatmul.mubr.f32.gmra.mrb[42].mxu0 %v697_v8  ;;  %v699_v15 = vmax.f32 %v657_v9, 0.0 }
 0x1ed   :  { %v698_v12 = vmax.f32 %v652_v11, 0.0  ;;  %v1290_v13 = vpop.f32.mrb[46].mxu1 }
 0x1ee   :  { %v667_v16 = vadd.f32 %v1290_v13, %v1786_v51  ;;  %v661_v17 = vpop.f32.mrb[47].mxu1 }
 0x1ef   :  { %v662_v18 = vadd.f32 %v1786_v51, %v661_v17  ;;  %1365 = vmatprep.mubr.f32.mxu0 %v698_v12 }
 0x1f0   :  { %1366 = vmatmul.mubr.f32.gmra.mrb[44].mxu0 %v699_v15  ;;  %v701_v20 = vmax.f32 %v667_v16, 0.0 }
 0x1f1   :  { %v700_v19 = vmax.f32 %v662_v18, 0.0 }
 0x1f3   :  { %1368 = vmatprep.mubr.f32.mxu0 %v700_v19 }
 0x1f4   :  { %1369 = vmatmul.mubr.f32.gmra.mrb[46].mxu0 %v701_v20 }
 0x28b   :  { %v1325_v23 = vpop.f32.mrb[16].mxu0 }
 0x28c   :  { %v796_v24 = vadd.f32 %v1325_v23, %v1823_v22  ;;  %v790_v25 = vpop.f32.mrb[17].mxu0 }
 0x28d   :  { %v791_v26 = vadd.f32 %v1823_v22, %v790_v25 }
 0x28e   :  { %950 = vst [vmem:[#allocation2 + $0x8] sm:$0xff] %v796_v24 }
 0x28f   :  { %949 = vst [vmem:[#allocation2] sm:$0xff] %v791_v26  ;;  %v1328_v51 = vpop.f32.mrb[18].mxu0 }
 0x290   :  { %v806_v27 = vadd.f32 %v1328_v51, %v1823_v22  ;;  %v800_v21 = vpop.f32.mrb[19].mxu0 }
 0x291   :  { %v801_v28 = vadd.f32 %v1823_v22, %v800_v21 }
 0x292   :  { %952 = vst [vmem:[#allocation2 + $0x18] sm:$0xff] %v806_v27 }
 0x293   :  { %951 = vst [vmem:[#allocation2 + $0x10] sm:$0xff] %v801_v28  ;;  %v1331_v30 = vpop.f32.mrb[20].mxu0 }
 0x294   :  { %v816_v31 = vadd.f32 %v1331_v30, %v1823_v22  ;;  %v810_v32 = vpop.f32.mrb[21].mxu0 }
 0x295   :  { %v811_v29 = vadd.f32 %v1823_v22, %v810_v32 }
 0x296   :  { %954 = vst [vmem:[#allocation2 + $0x28] sm:$0xff] %v816_v31 }
 0x297   :  { %953 = vst [vmem:[#allocation2 + $0x20] sm:$0xff] %v811_v29  ;;  %v1334_v33 = vpop.f32.mrb[22].mxu0 }
 0x298   :  { %v826_v34 = vadd.f32 %v1334_v33, %v1823_v22  ;;  %v820_v35 = vpop.f32.mrb[23].mxu0 }
 0x299   :  { %v821_v36 = vadd.f32 %v1823_v22, %v820_v35 }
 0x29a   :  { %956 = vst [vmem:[#allocation2 + $0x38] sm:$0xff] %v826_v34 }
 0x29b   :  { %955 = vst [vmem:[#allocation2 + $0x30] sm:$0xff] %v821_v36  ;;  %v1337_v37 = vpop.f32.mrb[24].mxu0 }
 0x29c   :  { %v836_v38 = vadd.f32 %v1337_v37, %v1823_v22  ;;  %v830_v39 = vpop.f32.mrb[25].mxu0 }
 0x29d   :  { %v831_v40 = vadd.f32 %v1823_v22, %v830_v39 }
 0x29e   :  { %958 = vst [vmem:[#allocation2 + $0x48] sm:$0xff] %v836_v38 }
 0x29f   :  { %957 = vst [vmem:[#allocation2 + $0x40] sm:$0xff] %v831_v40  ;;  %v1340_v41 = vpop.f32.mrb[26].mxu0 }
 0x2a0   :  { %v846_v42 = vadd.f32 %v1340_v41, %v1823_v22  ;;  %v840_v43 = vpop.f32.mrb[27].mxu0 }
 0x2a1   :  { %v841_v44 = vadd.f32 %v1823_v22, %v840_v43 }
 0x2a2   :  { %960 = vst [vmem:[#allocation2 + $0x58] sm:$0xff] %v846_v42 }
 0x2a3   :  { %959 = vst [vmem:[#allocation2 + $0x50] sm:$0xff] %v841_v44  ;;  %v1343_v45 = vpop.f32.mrb[28].mxu0 }
 0x2a4   :  { %v856_v46 = vadd.f32 %v1343_v45, %v1823_v22  ;;  %v850_v47 = vpop.f32.mrb[29].mxu0 }
 0x2a5   :  { %v851_v48 = vadd.f32 %v1823_v22, %v850_v47 }
 0x2a6   :  { %962 = vst [vmem:[#allocation2 + $0x68] sm:$0xff] %v856_v46 }
 0x2a7   :  { %961 = vst [vmem:[#allocation2 + $0x60] sm:$0xff] %v851_v48  ;;  %v1346_v49 = vpop.f32.mrb[30].mxu0 }
 0x2a8   :  { %v866_v50 = vadd.f32 %v1346_v49, %v1823_v22  ;;  %v860_v14 = vpop.f32.mrb[31].mxu0 }
 0x2a9   :  { %v861_v52 = vadd.f32 %v1823_v22, %v860_v14 }
 0x2aa   :  { %964 = vst [vmem:[#allocation2 + $0x78] sm:$0xff] %v866_v50 }
 0x2ab   :  { %963 = vst [vmem:[#allocation2 + $0x70] sm:$0xff] %v861_v52  ;;  %v1349_v53 = vpop.f32.mrb[32].mxu0 }
 0x2ac   :  { %v876_v54 = vadd.f32 %v1349_v53, %v1823_v22  ;;  %v870_v55 = vpop.f32.mrb[33].mxu0 }
 0x2ad   :  { %v871_v56 = vadd.f32 %v1823_v22, %v870_v55 }
 0x2ae   :  { %966 = vst [vmem:[#allocation2 + $0x88] sm:$0xff] %v876_v54 }
 0x2af   :  { %965 = vst [vmem:[#allocation2 + $0x80] sm:$0xff] %v871_v56  ;;  %v1352_v57 = vpop.f32.mrb[34].mxu0 }
 0x2b0   :  { %v886_v58 = vadd.f32 %v1352_v57, %v1823_v22  ;;  %v880_v59 = vpop.f32.mrb[35].mxu0 }
 0x2b1   :  { %v881_v60 = vadd.f32 %v1823_v22, %v880_v59 }
 0x2b2   :  { %968 = vst [vmem:[#allocation2 + $0x98] sm:$0xff] %v886_v58 }
 0x2b3   :  { %967 = vst [vmem:[#allocation2 + $0x90] sm:$0xff] %v881_v60  ;;  %v1355_v61 = vpop.f32.mrb[36].mxu0 }
 0x2b4   :  { %v896_v62 = vadd.f32 %v1355_v61, %v1823_v22  ;;  %v890_v63 = vpop.f32.mrb[37].mxu0 }
 0x2b5   :  { %v891_v0 = vadd.f32 %v1823_v22, %v890_v63 }
 0x2b6   :  { %970 = vst [vmem:[#allocation2 + $0xa8] sm:$0xff] %v896_v62 }
 0x2b7   :  { %969 = vst [vmem:[#allocation2 + $0xa0] sm:$0xff] %v891_v0  ;;  %v1358_v1 = vpop.f32.mrb[38].mxu0 }
 0x2b8   :  { %v906_v2 = vadd.f32 %v1358_v1, %v1823_v22  ;;  %v900_v3 = vpop.f32.mrb[39].mxu0 }
 0x2b9   :  { %v901_v4 = vadd.f32 %v1823_v22, %v900_v3 }
 0x2ba   :  { %972 = vst [vmem:[#allocation2 + $0xb8] sm:$0xff] %v906_v2 }
 0x2bb   :  { %971 = vst [vmem:[#allocation2 + $0xb0] sm:$0xff] %v901_v4  ;;  %v1361_v5 = vpop.f32.mrb[40].mxu0 }
 0x2bc   :  { %v916_v6 = vadd.f32 %v1361_v5, %v1823_v22  ;;  %v910_v7 = vpop.f32.mrb[41].mxu0 }
 0x2bd   :  { %v911_v8 = vadd.f32 %v1823_v22, %v910_v7 }
 0x2be   :  { %974 = vst [vmem:[#allocation2 + $0xc8] sm:$0xff] %v916_v6 }
 0x2bf   :  { %973 = vst [vmem:[#allocation2 + $0xc0] sm:$0xff] %v911_v8  ;;  %v1364_v9 = vpop.f32.mrb[42].mxu0 }
 0x2c0   :  { %v926_v10 = vadd.f32 %v1364_v9, %v1823_v22  ;;  %v920_v11 = vpop.f32.mrb[43].mxu0 }
 0x2c1   :  { %v921_v12 = vadd.f32 %v1823_v22, %v920_v11 }
 0x2c2   :  { %976 = vst [vmem:[#allocation2 + $0xd8] sm:$0xff] %v926_v10 }
 0x2c3   :  { %975 = vst [vmem:[#allocation2 + $0xd0] sm:$0xff] %v921_v12  ;;  %v1367_v13 = vpop.f32.mrb[44].mxu0 }
 0x2c4   :  { %v936_v15 = vadd.f32 %v1367_v13, %v1823_v22  ;;  %v930_v16 = vpop.f32.mrb[45].mxu0 }
 0x2c5   :  { %v931_v17 = vadd.f32 %v1823_v22, %v930_v16 }
 0x2c6   :  { %978 = vst [vmem:[#allocation2 + $0xe8] sm:$0xff] %v936_v15 }
 0x2c7   :  { %977 = vst [vmem:[#allocation2 + $0xe0] sm:$0xff] %v931_v17  ;;  %v1370_v18 = vpop.f32.mrb[46].mxu0 }
 0x2c8   :  { %v946_v19 = vadd.f32 %v1370_v18, %v1823_v22  ;;  %v940_v20 = vpop.f32.mrb[47].mxu0 }
 0x2c9   :  { %v941_v23 = vadd.f32 %v1823_v22, %v940_v20 }
 0x2ca   :  { %980 = vst [vmem:[#allocation2 + $0xf8] sm:$0xff] %v946_v19 }
 0x2cb   :  { %979 = vst [vmem:[#allocation2 + $0xf0] sm:$0xff] %v941_v23 }
 0x2cc   :  { %1451 = shalt.err (!%p1448_p4)
}
 0x2cd   :  { %s1452_s13 = scalar_lea.hbm %s1876_s7, 4096 }
 0x2ce   :  { %p1453_p5 = scmp.ne.s32.totalorder %s1876_s7, %s1452_s13  ;;  %p1456_p6 = scmp.lt.u32.totalorder %s1452_s13, %s1876_s7 }
 0x2d0   :  { %p1458_p7 = pnand %p1456_p6, %p1453_p5 }
 0x2d2   :  { %1461 = shalt.err (!%p1458_p7)
}
 0x2d3   :  { %s1465_s18 = smov 128   ;;  %s1466_s19 = smov 8  }
 0x2d4   :  { %992 = dma.vmem_to_hbm [thread:$0]  %s987_s9, 4096, %s1876_s7, [#allocation3], %s1465_s18, %s1465_s18, %s1466_s19  }
 0x2d5   :  { %1462 = dma.done.wait [#allocation3], 4096  }
 0x2d6   :  { %1463 = vsyncadd [#allocation3], 4294963200 }
 0x2d7   :  { %996 = vsyncpa [#allocation3], 1 }

</bundles_post_ra>
